<compile_context>
chip_gen: v7x
topology: tpu7x:2x2x1
jax: 0.10.0
libtpu: 0.0.40
codegen_flags: <defaults>
</compile_context>

<pallas_src>
import numpy as np
import jax
import jax.numpy as jnp
from jax.experimental import pallas as pl
from jax.experimental.pallas import tpu as pltpu


def _round_up(v, m):
    return (v + m - 1) // m * m


def _gaussian_time_matrix(T, sigma=5.0):
    # TODO(synk): the reference `gaussian_filter` helper is not defined in the
    # module; approximated here as circular 1-D gaussian smoothing along the
    # time axis (sigma=5).  With small T the circulant wraps and approaches a
    # temporal mean.
    r = int(3 * sigma)
    offsets = np.arange(-r, r + 1)
    g = np.exp(-0.5 * (offsets / sigma) ** 2)
    g /= g.sum()
    K = np.zeros((T, T), np.float32)
    for t in range(T):
        for d, w in zip(offsets, g):
            K[t, (t + d) % T] += w
    return jnp.asarray(K)


def _gelu_tanh(x):
    # TODO(synk): torch F.gelu default is the exact erf form; tanh approximation
    # used here (mul/add/tanh only -> guaranteed Mosaic lowering).
    c = np.float32(np.sqrt(2.0 / np.pi))
    return 0.5 * x * (1.0 + jnp.tanh(c * (x + np.float32(0.044715) * x * x * x)))


# ----------------------------------------------------------------------------
# Single fused kernel (one grid step):
#   x      : [BT, IC]
#   w1c    : [IC, NO*H]      fused per-level first-linear weights
#   b1c    : [1,  NO*H]
#   w2mu   : [NO*H, NO]      block-diagonal mu columns of w2
#   w2sig  : [NO*H, NO]      block-diagonal sigma columns of w2
#   b2mu   : [1, NO], b2sig : [1, NO]
#   seg    : [NO, Ppad]      0/1 segment-indicator (level -> pixel columns)
#   kmat   : [T, T]          circulant temporal gaussian smoothing matrix
#   raw    : [B, T, Ppad]    raw gaussian noise (all levels concatenated, padded)
#   out    : [B, T, Ppad]    mu + sig * smoothed(raw), lane-dense
# ----------------------------------------------------------------------------
def _noise_fused_kernel(x_ref, w1_ref, b1_ref, w2mu_ref, w2sig_ref,
                        b2mu_ref, b2sig_ref, seg_ref, kmat_ref, raw_ref,
                        out_ref):
    B, T, Ppad = raw_ref.shape

    # First per-level linear, fused across the NO levels.
    h = jnp.dot(x_ref[...], w1_ref[...], preferred_element_type=jnp.float32)
    h = _gelu_tanh(h + b1_ref[...])
    # TODO(synk): dropout evaluated in eval mode (identity), i.e. self.training=False.

    # Second linear (block-diagonal over levels): per-level mu / sigma, [BT, NO].
    mu = jnp.dot(h, w2mu_ref[...], preferred_element_type=jnp.float32) + b2mu_ref[...]
    sig = jnp.dot(h, w2sig_ref[...], preferred_element_type=jnp.float32) + b2sig_ref[...]

    # Broadcast each level's mu / sigma over its lane-aligned pixel segment.
    mu_slab = jnp.dot(mu, seg_ref[...], preferred_element_type=jnp.float32)    # [BT, Ppad]
    sig_slab = jnp.dot(sig, seg_ref[...], preferred_element_type=jnp.float32)  # [BT, Ppad]

    # Temporal gaussian smoothing of the raw noise + affine, written per batch.
    for b in range(B):  # B is static and tiny -> unrolled
        sm = jnp.dot(kmat_ref[...], raw_ref[b], preferred_element_type=jnp.float32)
        out_ref[b] = mu_slab[b * T:(b + 1) * T, :] + sig_slab[b * T:(b + 1) * T, :] * sm


def prepare_noise_params(w1, b1, w2, b2, T, sizes, sigma=5.0):
    """Build the fused, frozen constants once (module-init time).

    w1 : [NO, IC, H]   b1 : [NO, H]   w2 : [H, 2]   b2 : [2]
    """
    NO, IC, H = w1.shape
    psizes = [int(s) * int(s) for s in sizes]
    padded = [_round_up(p, 128) for p in psizes]           # lane-align each level
    offsets = np.concatenate([[0], np.cumsum(padded)[:-1]]).astype(int)
    Ppad = int(np.sum(padded))

    # Fused first linear: w1c[c, i*H + j] = w1[i, c, j]
    w1c = jnp.transpose(jnp.asarray(w1, jnp.float32), (1, 0, 2)).reshape(IC, NO * H)
    b1c = jnp.asarray(b1, jnp.float32).reshape(1, NO * H)

    # Block-diagonal second linear (mu and sigma columns separately).
    w2_np = np.asarray(w2, np.float32)
    b2_np = np.asarray(b2, np.float32)
    w2mu = np.zeros((NO * H, NO), np.float32)
    w2sig = np.zeros((NO * H, NO), np.float32)
    for i in range(NO):
        w2mu[i * H:(i + 1) * H, i] = w2_np[:, 0]
        w2sig[i * H:(i + 1) * H, i] = w2_np[:, 1]
    b2mu = np.full((1, NO), b2_np[0], np.float32)
    b2sig = np.full((1, NO), b2_np[1], np.float32)

    # Segment indicator: level i owns columns [offsets[i], offsets[i] + s_i^2).
    seg = np.zeros((NO, Ppad), np.float32)
    for i in range(NO):
        seg[i, offsets[i]:offsets[i] + psizes[i]] = 1.0

    return dict(
        w1c=w1c, b1c=b1c,
        w2mu=jnp.asarray(w2mu), w2sig=jnp.asarray(w2sig),
        b2mu=jnp.asarray(b2mu), b2sig=jnp.asarray(b2sig),
        seg=jnp.asarray(seg),
        kmat=_gaussian_time_matrix(T, sigma),
        sizes=tuple(int(s) for s in sizes),
        offsets=tuple(int(o) for o in offsets),
        ppad=Ppad,
    )


def noise_forward(params, x, key):
    """x : [B, T, in_channels]  ->  list of [B, T, s_i, s_i] noise maps."""
    B, T, IC = x.shape
    NO = len(params["sizes"])
    H = params["w1c"].shape[1] // NO
    Ppad = params["ppad"]
    BT = B * T

    x2d = x.reshape(BT, IC).astype(jnp.float32)
    # Raw gaussian noise for all levels in one call (padded columns are unused;
    # could move in-kernel via pltpu.prng_* to drop this HBM round-trip).
    raw = jax.random.normal(key, (B, T, Ppad), jnp.float32)

    slab = pl.pallas_call(
        _noise_fused_kernel,
        out_shape=jax.ShapeDtypeStruct((B, T, Ppad), jnp.float32),
        grid=(1,),
        in_specs=[
            pl.BlockSpec((BT, IC), lambda i: (0, 0)),
            pl.BlockSpec((IC, NO * H), lambda i: (0, 0)),
            pl.BlockSpec((1, NO * H), lambda i: (0, 0)),
            pl.BlockSpec((NO * H, NO), lambda i: (0, 0)),
            pl.BlockSpec((NO * H, NO), lambda i: (0, 0)),
            pl.BlockSpec((1, NO), lambda i: (0, 0)),
            pl.BlockSpec((1, NO), lambda i: (0, 0)),
            pl.BlockSpec((NO, Ppad), lambda i: (0, 0)),
            pl.BlockSpec((T, T), lambda i: (0, 0)),
            pl.BlockSpec((B, T, Ppad), lambda i: (0, 0, 0)),
        ],
        out_specs=pl.BlockSpec((B, T, Ppad), lambda i: (0, 0, 0)),
        compiler_params=pltpu.CompilerParams(
            dimension_semantics=("arbitrary",)),
    )(x2d, params["w1c"], params["b1c"], params["w2mu"], params["w2sig"],
      params["b2mu"], params["b2sig"], params["seg"], params["kmat"], raw)

    noises = []
    for i, s in enumerate(params["sizes"]):
        off = params["offsets"][i]
        noises.append(slab[:, :, off:off + s * s].reshape(B, T, s, s))
    return noises


if __name__ == "__main__":
    # module-like config: in_channels=32, n_outputs=4, dropout=0.1 (eval mode)
    in_channels, n_outputs = 32, 4
    B, T = 2, 8
    H = in_channels // 2
    sizes = tuple(2 ** (i + 2) for i in range(n_outputs))   # 4, 8, 16, 32

    key = jax.random.PRNGKey(0)
    k_w1, k_b1, k_w2, k_b2, k_x, k_noise = jax.random.split(key, 6)

    # deterministic parameters (kaiming-style scale; exact init is irrelevant
    # to the kernel semantics)
    w1 = jax.random.uniform(k_w1, (n_outputs, in_channels, H), jnp.float32,
                            -1.0, 1.0) / np.sqrt(in_channels)
    b1 = jax.random.uniform(k_b1, (n_outputs, H), jnp.float32,
                            -1.0, 1.0) / np.sqrt(in_channels)
    w2 = jax.random.uniform(k_w2, (H, 2), jnp.float32, -1.0, 1.0) / np.sqrt(H)
    b2 = jax.random.uniform(k_b2, (2,), jnp.float32, -1.0, 1.0) / np.sqrt(H)

    x = jax.random.normal(k_x, (B, T, in_channels), jnp.float32)

    params = prepare_noise_params(w1, b1, w2, b2, T, sizes, sigma=5.0)
    noises = noise_forward(params, x, k_noise)

    for n in noises:
        jax.block_until_ready(n)

    for i, n in enumerate(noises):
        s = 2 ** (i + 2)
        assert n.shape == (B, T, s, s), n.shape
        assert bool(jnp.all(jnp.isfinite(n)))

    print("KERNEL_OK")
</pallas_src>

<mosaic_0001>
module attributes {stable_mosaic.version = 11 : i64} {
  func.func @_noise_fused_kernel(%arg0: i32, %arg1: memref<16x32xf32, #tpu.memory_space<vmem>>, %arg2: memref<32x64xf32, #tpu.memory_space<vmem>>, %arg3: memref<1x64xf32, #tpu.memory_space<vmem>>, %arg4: memref<64x4xf32, #tpu.memory_space<vmem>>, %arg5: memref<64x4xf32, #tpu.memory_space<vmem>>, %arg6: memref<1x4xf32, #tpu.memory_space<vmem>>, %arg7: memref<1x4xf32, #tpu.memory_space<vmem>>, %arg8: memref<4x1536xf32, #tpu.memory_space<vmem>>, %arg9: memref<8x8xf32, #tpu.memory_space<vmem>>, %arg10: memref<2x8x1536xf32, #tpu.memory_space<vmem>>, %arg11: memref<2x8x1536xf32, #tpu.memory_space<vmem>>) attributes {dimension_semantics = [#tpu.dimension_semantics<arbitrary>], iteration_bounds = array<i64: 1>, scalar_prefetch = 0 : i64, scratch_operands = 0 : i64, tpu.core_type = #tpu.core_type<tc>, window_params = [{pipeline_mode = #tpu.pipeline_mode<synchronous>, transform_indices = @transform_0, window_bounds = array<i64: 16, 32>}, {pipeline_mode = #tpu.pipeline_mode<synchronous>, transform_indices = @transform_1, window_bounds = array<i64: 32, 64>}, {pipeline_mode = #tpu.pipeline_mode<synchronous>, transform_indices = @transform_2, window_bounds = array<i64: 1, 64>}, {pipeline_mode = #tpu.pipeline_mode<synchronous>, transform_indices = @transform_3, window_bounds = array<i64: 64, 4>}, {pipeline_mode = #tpu.pipeline_mode<synchronous>, transform_indices = @transform_4, window_bounds = array<i64: 64, 4>}, {pipeline_mode = #tpu.pipeline_mode<synchronous>, transform_indices = @transform_5, window_bounds = array<i64: 1, 4>}, {pipeline_mode = #tpu.pipeline_mode<synchronous>, transform_indices = @transform_6, window_bounds = array<i64: 1, 4>}, {pipeline_mode = #tpu.pipeline_mode<synchronous>, transform_indices = @transform_7, window_bounds = array<i64: 4, 1536>}, {pipeline_mode = #tpu.pipeline_mode<synchronous>, transform_indices = @transform_8, window_bounds = array<i64: 8, 8>}, {pipeline_mode = #tpu.pipeline_mode<synchronous>, transform_indices = @transform_9, window_bounds = array<i64: 2, 8, 1536>}, {pipeline_mode = #tpu.pipeline_mode<synchronous>, transform_indices = @transform_10, window_bounds = array<i64: 2, 8, 1536>}]} {
    %c0 = arith.constant 0 : index
    %c0_0 = arith.constant 0 : index
    %0 = vector.load %arg1[%c0, %c0_0] : memref<16x32xf32, #tpu.memory_space<vmem>>, vector<16x32xf32>
    %c0_1 = arith.constant 0 : index
    %c0_2 = arith.constant 0 : index
    %1 = vector.load %arg2[%c0_1, %c0_2] : memref<32x64xf32, #tpu.memory_space<vmem>>, vector<32x64xf32>
    %cst = arith.constant dense<0.000000e+00> : vector<16x64xf32>
    %2 = tpu.matmul %0, %1, %cst {dimension_numbers = #tpu.dot_dimension_numbers<[1], [0], [0], [1], [0, 0, 1, 1], [], []>} : vector<16x32xf32>, vector<32x64xf32>, vector<16x64xf32> -> vector<16x64xf32>
    %c0_3 = arith.constant 0 : index
    %c0_4 = arith.constant 0 : index
    %3 = vector.load %arg3[%c0_3, %c0_4] : memref<1x64xf32, #tpu.memory_space<vmem>>, vector<1x64xf32>
    %4 = vector.broadcast %3 : vector<1x64xf32> to vector<16x64xf32>
    %5 = arith.addf %2, %4 : vector<16x64xf32>
    %cst_5 = arith.constant 5.000000e-01 : f32
    %6 = vector.broadcast %cst_5 : f32 to vector<16x64xf32>
    %7 = arith.mulf %6, %5 : vector<16x64xf32>
    %cst_6 = arith.constant 4.471500e-02 : f32
    %8 = vector.broadcast %cst_6 : f32 to vector<16x64xf32>
    %9 = arith.mulf %8, %5 : vector<16x64xf32>
    %10 = arith.mulf %9, %5 : vector<16x64xf32>
    %11 = arith.mulf %10, %5 : vector<16x64xf32>
    %12 = arith.addf %5, %11 : vector<16x64xf32>
    %cst_7 = arith.constant 0.797884583 : f32
    %13 = vector.broadcast %cst_7 : f32 to vector<16x64xf32>
    %14 = arith.mulf %13, %12 : vector<16x64xf32>
    %15 = math.tanh %14 : vector<16x64xf32>
    %cst_8 = arith.constant 1.000000e+00 : f32
    %16 = vector.broadcast %cst_8 : f32 to vector<16x64xf32>
    %17 = arith.addf %16, %15 : vector<16x64xf32>
    %18 = arith.mulf %7, %17 : vector<16x64xf32>
    %c0_9 = arith.constant 0 : index
    %c0_10 = arith.constant 0 : index
    %19 = vector.load %arg4[%c0_9, %c0_10] : memref<64x4xf32, #tpu.memory_space<vmem>>, vector<64x4xf32>
    %cst_11 = arith.constant dense<0.000000e+00> : vector<16x4xf32>
    %20 = tpu.matmul %18, %19, %cst_11 {dimension_numbers = #tpu.dot_dimension_numbers<[1], [0], [0], [1], [0, 0, 1, 1], [], []>} : vector<16x64xf32>, vector<64x4xf32>, vector<16x4xf32> -> vector<16x4xf32>
    %c0_12 = arith.constant 0 : index
    %c0_13 = arith.constant 0 : index
    %21 = vector.load %arg6[%c0_12, %c0_13] : memref<1x4xf32, #tpu.memory_space<vmem>>, vector<1x4xf32>
    %22 = vector.broadcast %21 : vector<1x4xf32> to vector<16x4xf32>
    %23 = arith.addf %20, %22 : vector<16x4xf32>
    %c0_14 = arith.constant 0 : index
    %c0_15 = arith.constant 0 : index
    %24 = vector.load %arg5[%c0_14, %c0_15] : memref<64x4xf32, #tpu.memory_space<vmem>>, vector<64x4xf32>
    %cst_16 = arith.constant dense<0.000000e+00> : vector<16x4xf32>
    %25 = tpu.matmul %18, %24, %cst_16 {dimension_numbers = #tpu.dot_dimension_numbers<[1], [0], [0], [1], [0, 0, 1, 1], [], []>} : vector<16x64xf32>, vector<64x4xf32>, vector<16x4xf32> -> vector<16x4xf32>
    %c0_17 = arith.constant 0 : index
    %c0_18 = arith.constant 0 : index
    %26 = vector.load %arg7[%c0_17, %c0_18] : memref<1x4xf32, #tpu.memory_space<vmem>>, vector<1x4xf32>
    %27 = vector.broadcast %26 : vector<1x4xf32> to vector<16x4xf32>
    %28 = arith.addf %25, %27 : vector<16x4xf32>
    %c0_19 = arith.constant 0 : index
    %c0_20 = arith.constant 0 : index
    %29 = vector.load %arg8[%c0_19, %c0_20] : memref<4x1536xf32, #tpu.memory_space<vmem>>, vector<4x1536xf32>
    %cst_21 = arith.constant dense<0.000000e+00> : vector<16x1536xf32>
    %30 = tpu.matmul %23, %29, %cst_21 {dimension_numbers = #tpu.dot_dimension_numbers<[1], [0], [0], [1], [0, 0, 1, 1], [], []>} : vector<16x4xf32>, vector<4x1536xf32>, vector<16x1536xf32> -> vector<16x1536xf32>
    %c0_22 = arith.constant 0 : index
    %c0_23 = arith.constant 0 : index
    %31 = vector.load %arg8[%c0_22, %c0_23] : memref<4x1536xf32, #tpu.memory_space<vmem>>, vector<4x1536xf32>
    %cst_24 = arith.constant dense<0.000000e+00> : vector<16x1536xf32>
    %32 = tpu.matmul %28, %31, %cst_24 {dimension_numbers = #tpu.dot_dimension_numbers<[1], [0], [0], [1], [0, 0, 1, 1], [], []>} : vector<16x4xf32>, vector<4x1536xf32>, vector<16x1536xf32> -> vector<16x1536xf32>
    %c0_25 = arith.constant 0 : index
    %c0_26 = arith.constant 0 : index
    %33 = vector.load %arg9[%c0_25, %c0_26] : memref<8x8xf32, #tpu.memory_space<vmem>>, vector<8x8xf32>
    %c0_27 = arith.constant 0 : index
    %c0_28 = arith.constant 0 : index
    %c0_29 = arith.constant 0 : index
    %34 = vector.load %arg10[%c0_27, %c0_28, %c0_29] : memref<2x8x1536xf32, #tpu.memory_space<vmem>>, vector<1x8x1536xf32>
    %35 = vector.shape_cast %34 : vector<1x8x1536xf32> to vector<8x1536xf32>
    %cst_30 = arith.constant dense<0.000000e+00> : vector<8x1536xf32>
    %36 = tpu.matmul %33, %35, %cst_30 {dimension_numbers = #tpu.dot_dimension_numbers<[1], [0], [0], [1], [0, 0, 1, 1], [], []>} : vector<8x8xf32>, vector<8x1536xf32>, vector<8x1536xf32> -> vector<8x1536xf32>
    %37 = vector.extract_strided_slice %30 {offsets = [0, 0], sizes = [8, 1536], strides = [1, 1]} : vector<16x1536xf32> to vector<8x1536xf32>
    %38 = vector.extract_strided_slice %32 {offsets = [0, 0], sizes = [8, 1536], strides = [1, 1]} : vector<16x1536xf32> to vector<8x1536xf32>
    %39 = arith.mulf %38, %36 : vector<8x1536xf32>
    %40 = arith.addf %37, %39 : vector<8x1536xf32>
    %c0_31 = arith.constant 0 : index
    %c0_32 = arith.constant 0 : index
    %c0_33 = arith.constant 0 : index
    %41 = vector.load %arg11[%c0_31, %c0_32, %c0_33] : memref<2x8x1536xf32, #tpu.memory_space<vmem>>, vector<1x8x1536xf32>
    %42 = vector.shape_cast %41 : vector<1x8x1536xf32> to vector<8x1536xf32>
    %43 = vector.shape_cast %40 : vector<8x1536xf32> to vector<1x8x1536xf32>
    tpu.vector_store %arg11[%c0_31, %c0_32, %c0_33], %43 {strides = array<i32>} : memref<2x8x1536xf32, #tpu.memory_space<vmem>>, vector<1x8x1536xf32>,
    %c0_34 = arith.constant 0 : index
    %c0_35 = arith.constant 0 : index
    %44 = vector.load %arg9[%c0_34, %c0_35] : memref<8x8xf32, #tpu.memory_space<vmem>>, vector<8x8xf32>
    %c1 = arith.constant 1 : index
    %c0_36 = arith.constant 0 : index
    %c0_37 = arith.constant 0 : index
    %45 = vector.load %arg10[%c1, %c0_36, %c0_37] : memref<2x8x1536xf32, #tpu.memory_space<vmem>>, vector<1x8x1536xf32>
    %46 = vector.shape_cast %45 : vector<1x8x1536xf32> to vector<8x1536xf32>
    %cst_38 = arith.constant dense<0.000000e+00> : vector<8x1536xf32>
    %47 = tpu.matmul %44, %46, %cst_38 {dimension_numbers = #tpu.dot_dimension_numbers<[1], [0], [0], [1], [0, 0, 1, 1], [], []>} : vector<8x8xf32>, vector<8x1536xf32>, vector<8x1536xf32> -> vector<8x1536xf32>
    %48 = vector.extract_strided_slice %30 {offsets = [8, 0], sizes = [8, 1536], strides = [1, 1]} : vector<16x1536xf32> to vector<8x1536xf32>
    %49 = vector.extract_strided_slice %32 {offsets = [8, 0], sizes = [8, 1536], strides = [1, 1]} : vector<16x1536xf32> to vector<8x1536xf32>
    %50 = arith.mulf %49, %47 : vector<8x1536xf32>
    %51 = arith.addf %48, %50 : vector<8x1536xf32>
    %c1_39 = arith.constant 1 : index
    %c0_40 = arith.constant 0 : index
    %c0_41 = arith.constant 0 : index
    %52 = vector.load %arg11[%c1_39, %c0_40, %c0_41] : memref<2x8x1536xf32, #tpu.memory_space<vmem>>, vector<1x8x1536xf32>
    %53 = vector.shape_cast %52 : vector<1x8x1536xf32> to vector<8x1536xf32>
    %54 = vector.shape_cast %51 : vector<8x1536xf32> to vector<1x8x1536xf32>
    tpu.vector_store %arg11[%c1_39, %c0_40, %c0_41], %54 {strides = array<i32>} : memref<2x8x1536xf32, #tpu.memory_space<vmem>>, vector<1x8x1536xf32>,
    return
  }
  func.func @transform_0(%arg0: i32) -> (i32, i32) {
    %c0_i32 = arith.constant 0 : i32
    %c0_i32_0 = arith.constant 0 : i32
    %c0_i32_1 = arith.constant 0 : i32
    return %c0_i32, %c0_i32_0 : i32, i32
  }
  func.func @transform_1(%arg0: i32) -> (i32, i32) {
    %c0_i32 = arith.constant 0 : i32
    %c0_i32_0 = arith.constant 0 : i32
    %c0_i32_1 = arith.constant 0 : i32
    return %c0_i32, %c0_i32_0 : i32, i32
  }
  func.func @transform_2(%arg0: i32) -> (i32, i32) {
    %c0_i32 = arith.constant 0 : i32
    %c0_i32_0 = arith.constant 0 : i32
    %c0_i32_1 = arith.constant 0 : i32
    return %c0_i32, %c0_i32_0 : i32, i32
  }
  func.func @transform_3(%arg0: i32) -> (i32, i32) {
    %c0_i32 = arith.constant 0 : i32
    %c0_i32_0 = arith.constant 0 : i32
    %c0_i32_1 = arith.constant 0 : i32
    return %c0_i32, %c0_i32_0 : i32, i32
  }
  func.func @transform_4(%arg0: i32) -> (i32, i32) {
    %c0_i32 = arith.constant 0 : i32
    %c0_i32_0 = arith.constant 0 : i32
    %c0_i32_1 = arith.constant 0 : i32
    return %c0_i32, %c0_i32_0 : i32, i32
  }
  func.func @transform_5(%arg0: i32) -> (i32, i32) {
    %c0_i32 = arith.constant 0 : i32
    %c0_i32_0 = arith.constant 0 : i32
    %c0_i32_1 = arith.constant 0 : i32
    return %c0_i32, %c0_i32_0 : i32, i32
  }
  func.func @transform_6(%arg0: i32) -> (i32, i32) {
    %c0_i32 = arith.constant 0 : i32
    %c0_i32_0 = arith.constant 0 : i32
    %c0_i32_1 = arith.constant 0 : i32
    return %c0_i32, %c0_i32_0 : i32, i32
  }
  func.func @transform_7(%arg0: i32) -> (i32, i32) {
    %c0_i32 = arith.constant 0 : i32
    %c0_i32_0 = arith.constant 0 : i32
    %c0_i32_1 = arith.constant 0 : i32
    return %c0_i32, %c0_i32_0 : i32, i32
  }
  func.func @transform_8(%arg0: i32) -> (i32, i32) {
    %c0_i32 = arith.constant 0 : i32
    %c0_i32_0 = arith.constant 0 : i32
    %c0_i32_1 = arith.constant 0 : i32
    return %c0_i32, %c0_i32_0 : i32, i32
  }
  func.func @transform_9(%arg0: i32) -> (i32, i32, i32) {
    %c0_i32 = arith.constant 0 : i32
    %c0_i32_0 = arith.constant 0 : i32
    %c0_i32_1 = arith.constant 0 : i32
    %c0_i32_2 = arith.constant 0 : i32
    return %c0_i32, %c0_i32_0, %c0_i32_1 : i32, i32, i32
  }
  func.func @transform_10(%arg0: i32) -> (i32, i32, i32) {
    %c0_i32 = arith.constant 0 : i32
    %c0_i32_0 = arith.constant 0 : i32
    %c0_i32_1 = arith.constant 0 : i32
    %c0_i32_2 = arith.constant 0 : i32
    return %c0_i32, %c0_i32_0, %c0_i32_1 : i32, i32, i32
  }
}

</mosaic_0001>

<bundles_post_ra>
// kernel: tpu_custom_call.1
= control target key start
LH: loop header
LB: loop body
LE: loop exit
PB: predicated region body
PF: predicated region fallthrough
CT: control target
= control target key end

     0   :  { %15 = vsyncpa [#allocation3], 0  ;;  %s2938_s0 = inlined_call_operand.vmem [shape: f32[16,32], index: 0, kind: input, shape index: {}]   ;;  %s2939_s1 = inlined_call_operand.vmem [shape: f32[32,64], index: 1, kind: input, shape index: {}]   ;;  %s2940_s2 = inlined_call_operand.vmem [shape: f32[1,64], index: 2, kind: input, shape index: {}]   ;;  %s2941_s3 = inlined_call_operand.vmem [shape: f32[64,4], index: 3, kind: input, shape index: {}]   ;;  %s2942_s4 = inlined_call_operand.vmem [shape: f32[64,4], index: 4, kind: input, shape index: {}]   ;;  %s2943_s5 = inlined_call_operand.vmem [shape: f32[1,4], index: 5, kind: input, shape index: {}]   ;;  %s2944_s6 = inlined_call_operand.vmem [shape: f32[1,4], index: 6, kind: input, shape index: {}]   ;;  %s2945_s7 = inlined_call_operand.vmem [shape: f32[4,1536], index: 7, kind: input, shape index: {}]   ;;  %s2946_s8 = inlined_call_operand.vmem [shape: f32[8,8], index: 8, kind: input, shape index: {}]   ;;  %s2947_s9 = inlined_call_operand.hbm [shape: f32[2,8,1536], index: 9, kind: input, shape index: {}]   ;;  %s2948_s10 = inlined_call_operand.hbm [shape: f32[2,8,1536], index: 10, kind: output, shape index: {}]  }
   0x1   :  { %16 = vsyncpa [#allocation4], 0  ;;  %s2553_s13 = smov [#allocation2]   ;;  %s2505_s17 = scalar_lea.hbm %s2947_s9, 3072 }
   0x2   :  { %s40_s14 = sshll.u32 %s2553_s13, 4  ;;  %p2506_p0 = scmp.ne.s32.totalorder %s2947_s9, %s2505_s17  ;;  %s41_s14 = int_to_ptr.vmem [resolvable:$true] %s40_s14 }
   0x3   :  { %p2509_p1 = scmp.lt.u32.totalorder %s2505_s17, %s2947_s9 }
   0x5   :  { %p2511_p2 = pnand %p2509_p1, %p2506_p0 }
   0x7   :  { %2514 = shalt.err (!%p2511_p2)
}
   0x8   :  { %s2515_s22 = scalar_lea.vmem %s41_s14, 3072  ;;  %p2520_p4 = scmp.lt.s32.totalorder %s41_s14, %s41_s14 }
   0x9   :  { %p2516_p3 = scmp.ne.s32.totalorder %s41_s14, %s2515_s22  ;;  %p2521_p5 = scmp.lt.s32.totalorder %s2515_s22, %s2515_s22 }
   0xb   :  { %p2522_p6 = por %p2521_p5, %p2520_p4 }
   0xd   :  { %p2523_p7 = pnand %p2522_p6, %p2516_p3 }
   0xf   :  { %2526 = shalt.err (!%p2523_p7)
}
  0x10   :  { %s2554_s23 = smov 1536   ;;  %s2555_s24 = smov 96  }
  0x11   :  { %46 = dma.hbm_to_vmem [thread:$0]  %s2947_s9, 3072, %s41_s14, [#allocation3], %s2554_s23, %s2554_s23, %s2555_s24  }
  0x12   :  { %2549 = dma.done.wait [#allocation3], 3072  }
  0x13   :  { %2550 = vsyncadd [#allocation3], 4294964224  ;;  %vm63_vm0 = vcmask 261120   ;;  %v52_v0 = vld [vmem:[%s2939_s1] sm:$0xff]  ;;  %v53_v1 = vld [vmem:[%s2939_s1 + $0x8] sm:$0xff]  ;;  %vm375_vm1 = vcmask 1043456  }
  0x14   :  { %v54_v2 = vld [vmem:[%s2939_s1 + $0x10] sm:$0xff]  ;;  %v2450_v3 = vpack.c.bf16 %v53_v1, %v52_v0  ;;  %v55_v4 = vld [vmem:[%s2939_s1 + $0x18] sm:$0xff]  ;;  %v50_v5 = vld [vmem:[%s2938_s0] sm:$0xff]  ;;  %vm178_vm2 = vcmask 523264   ;;  %v2556_v60 = vmov 0.0   ;;  %vm368_vm3 = vcmask 31744  }
  0x15   :  { %v2454_v6 = vpack.c.bf16 %v55_v4, %v54_v2  ;;  %2409 = vmatprep.mubr.msk.f32.mxu0 %vm63_vm0, %v50_v5  ;;  %v51_v7 = vld [vmem:[%s2938_s0 + $0x8] sm:$0xff]  ;;  %v163_v8 = vld [vmem:[%s2941_s3] sm:$0xff]  ;;  %v165_v13 = vld [vmem:[%s2941_s3 + $0x10] sm:$0xff]  ;;  %vm1343_vm4 = vcmask 64512  }
  0x16   :  { %2451 = vmatprep.subr.bf16.mxu0 %v2450_v3  ;;  %v164_v9 = vld [vmem:[%s2941_s3 + $0x8] sm:$0xff]  ;;  %v260_v10 = vld [vmem:[%s2942_s4] sm:$0xff]  ;;  %v166_v14 = vld [vmem:[%s2941_s3 + $0x18] sm:$0xff] }
  0x17   :  { %2453 = vmatpush3.bf16.msra.mxu0 %v2450_v3  ;;  %v2458_v11 = vpack.c.bf16 %v164_v9, %v163_v8  ;;  %v261_v12 = vld [vmem:[%s2942_s4 + $0x8] sm:$0xff]  ;;  %v2462_v16 = vpack.c.bf16 %v166_v14, %v165_v13  ;;  %v262_v17 = vld [vmem:[%s2942_s4 + $0x10] sm:$0xff]  ;;  %v263_v18 = vld [vmem:[%s2942_s4 + $0x18] sm:$0xff] }
  0x18   :  { %2455 = vmatprep.subr.bf16.mxu0 %v2454_v6  ;;  %v2474_v15 = vpack.c.bf16 %v261_v12, %v260_v10  ;;  %v167_v19 = vld [vmem:[%s2941_s3 + $0x20] sm:$0xff]  ;;  %v2478_v20 = vpack.c.bf16 %v263_v18, %v262_v17  ;;  %v168_v21 = vld [vmem:[%s2941_s3 + $0x28] sm:$0xff]  ;;  %v169_v26 = vld [vmem:[%s2941_s3 + $0x30] sm:$0xff] }
  0x19   :  { %2459 = vmatprep.subr.bf16.mxu1 %v2458_v11  ;;  %v264_v22 = vld [vmem:[%s2942_s4 + $0x20] sm:$0xff]  ;;  %v265_v23 = vld [vmem:[%s2942_s4 + $0x28] sm:$0xff]  ;;  %v2466_v24 = vpack.c.bf16 %v168_v21, %v167_v19  ;;  %v170_v27 = vld [vmem:[%s2941_s3 + $0x38] sm:$0xff] }
  0x1a   :  { %2461 = vmatpush3.bf16.msra.mxu1 %v2458_v11  ;;  %v2482_v25 = vpack.c.bf16 %v265_v23, %v264_v22  ;;  %v266_v28 = vld [vmem:[%s2942_s4 + $0x30] sm:$0xff]  ;;  %v267_v29 = vld [vmem:[%s2942_s4 + $0x38] sm:$0xff]  ;;  %v2470_v30 = vpack.c.bf16 %v170_v27, %v169_v26  ;;  %v2697_v32 = vld [vmem:[%s2945_s7] sm:$0xff] }
  0x1b   :  { %2457 = vmatpush3.bf16.msra.mxu0 %v2454_v6  ;;  %2463 = vmatprep.subr.bf16.mxu1 %v2462_v16  ;;  %v2486_v31 = vpack.c.bf16 %v267_v29, %v266_v28  ;;  %v2701_v33 = vcombine.high %v2697_v32, %v2697_v32  ;;  %v2306_v34 = vld [vmem:[%s2940_s2] ss:$0 sm:$0xff]  ;;  %v351_v57 = vld [vmem:[%s2945_s7 + $0x8] sm:$0xff]  ;;  %v352_v59 = vld [vmem:[%s2945_s7 + $0x10] sm:$0xff] }
  0x1c   :  { %2475 = vmatprep.subr.bf16.mxu0 %v2474_v15  ;;  %v363_v58 = vcombine.high %v351_v57, %v351_v57  ;;  %v364_v61 = vcombine.high %v352_v59, %v352_v59  ;;  %v353_v62 = vld [vmem:[%s2945_s7 + $0x18] sm:$0xff]  ;;  %v2309_v0 = vld [vmem:[%s2943_s5] ss:$0 sm:$0xff]  ;;  %v2736_v4 = vld [vmem:[%s2945_s7 + $0x28] sm:$0xff] }
  0x1d   :  { %v365_v63 = vcombine.high %v353_v62, %v353_v62  ;;  %v2731_v3 = vld [vmem:[%s2945_s7 + $0x20] sm:$0xff]  ;;  %v367_v9 = vcombine.high %v2736_v4, %v2736_v4  ;;  %v1332_v14 = vld [vmem:[#allocation2 + $0x8] sm:$0xff]  ;;  %v1334_v17 = vld [vmem:[#allocation2 + $0x18] sm:$0xff] }
  0x1e   :  { %2410 = vmatmul.mubr.msk.f32.vlgmr.msra.gmra.mrb[0].mxu0 %vm63_vm0, %v51_v7  ;;  %2465 = vmatpush3.bf16.msra.mxu1 %v2462_v16  ;;  %v366_v8 = vcombine.high %v2731_v3, %v2731_v3  ;;  %v2312_v11 = vld [vmem:[%s2944_s6] ss:$0 sm:$0xff]  ;;  %v1340_v19 = vld [vmem:[#allocation2 + $0x48] sm:$0xff]  ;;  %v1333_v21 = vld [vmem:[#allocation2 + $0x10] sm:$0xff] }
  0x1f   :  { %2477 = vmatpush3.bf16.msra.mxu0 %v2474_v15  ;;  %2467 = vmatprep.subr.bf16.mxu1 %v2466_v24  ;;  %v1336_v15 = vld [vmem:[#allocation2 + $0x28] sm:$0xff]  ;;  %v1331_v16 = vld [vmem:[#allocation2] sm:$0xff]  ;;  %v1338_v22 = vld [vmem:[#allocation2 + $0x38] sm:$0xff] }
  0x20   :  { %2479 = vmatprep.subr.bf16.mxu0 %v2478_v20  ;;  %v1335_v18 = vld [vmem:[#allocation2 + $0x20] sm:$0xff]  ;;  %v1342_v26 = vld [vmem:[#allocation2 + $0x58] sm:$0xff]  ;;  %v1816_v28 = vld [vmem:[#allocation2 + $0x88] sm:$0xff] }
  0x21   :  { %v1339_v23 = vld [vmem:[#allocation2 + $0x40] sm:$0xff]  ;;  %v1341_v29 = vld [vmem:[#allocation2 + $0x50] sm:$0xff] }
  0x22   :  { %2469 = vmatpush3.bf16.msra.mxu1 %v2466_v24  ;;  %v1812_v24 = vld [vmem:[#allocation2 + $0x68] sm:$0xff]  ;;  %v1811_v27 = vld [vmem:[#allocation2 + $0x60] sm:$0xff] }
  0x23   :  { %2481 = vmatpush3.bf16.msra.mxu0 %v2478_v20  ;;  %2471 = vmatprep.subr.bf16.mxu1 %v2470_v30  ;;  %v1330_v20 = vld [vmem:[%s2946_s8] sm:$0xff]  ;;  %s2557_s8 = smov [#allocation5]  }
  0x24   :  { %2483 = vmatprep.subr.bf16.mxu0 %v2482_v25  ;;  %s2294_s21 = sshll.u32 %s2557_s8, 4  ;;  %s2295_s21 = int_to_ptr.vmem [resolvable:$true] %s2294_s21 }
  0x25   :  { %s2527_s22 = scalar_lea.vmem %s2295_s21, 3072  ;;  %p2532_p9 = scmp.lt.s32.totalorder %s2295_s21, %s2295_s21 }
  0x26   :  { %2473 = vmatpush3.bf16.msra.mxu1 %v2470_v30  ;;  %v1814_v30 = vld [vmem:[#allocation2 + $0x78] sm:$0xff]  ;;  %p2528_p8 = scmp.ne.s32.totalorder %s2295_s21, %s2527_s22  ;;  %p2533_p10 = scmp.lt.s32.totalorder %s2527_s22, %s2527_s22 }
  0x27   :  { %2485 = vmatpush3.bf16.msra.mxu0 %v2482_v25  ;;  %2315 = vmatprep.subr.msk.mxu1 %vm375_vm1, %v2701_v33  ;;  %v1337_v25 = vld [vmem:[#allocation2 + $0x30] sm:$0xff] }
  0x28   :  { %2487 = vmatprep.subr.bf16.mxu0 %v2486_v31  ;;  %p2534_p11 = por %p2533_p10, %p2532_p9 }
  0x2a   :  { %p2535_p12 = pnand %p2534_p11, %p2528_p8 }
  0x2b   :  { %2489 = vmatpush3.bf16.msra.mxu0 %v2486_v31  ;;  %v1815_v31 = vld [vmem:[#allocation2 + $0x80] sm:$0xff] }
  0x2c   :  { %2319 = vmatprep.subr.msk.mxu0 %vm375_vm1, %v363_v58 }
  0xf1   :  { %v2411_v35 = vpop.f32.mrb[0].mxu0 }
  0xf2   :  { %v142_v36 = vadd.f32 %v2411_v35, %v2306_v34  ;;  %v136_v37 = vpop.f32.mrb[1].mxu0  ;;  %v1819_v35 = vld [vmem:[#allocation2 + $0xa0] sm:$0xff] }
  0xf3   :  { %v137_v38 = vadd.f32 %v2306_v34, %v136_v37  ;;  %v1818_v34 = vld [vmem:[#allocation2 + $0x98] sm:$0xff] }
  0xf4   :  { %v148_v39 = vmul.f32 0.044715, %v142_v36  ;;  %v146_v54 = vmul.f32 0.5, %v142_v36  ;;  %v1822_v37 = vld [vmem:[#allocation2 + $0xb8] sm:$0xff] }
  0xf5   :  { %v147_v40 = vmul.f32 0.044715, %v137_v38  ;;  %v145_v52 = vmul.f32 0.5, %v137_v38 }
  0xf6   :  { %v150_v41 = vmul.f32 %v148_v39, %v142_v36 }
  0xf7   :  { %v149_v42 = vmul.f32 %v147_v40, %v137_v38 }
  0xf8   :  { %v152_v43 = vmul.f32 %v150_v41, %v142_v36 }
  0xf9   :  { %v151_v44 = vmul.f32 %v149_v42, %v137_v38 }
  0xfa   :  { %v154_v45 = vadd.f32 %v152_v43, %v142_v36  ;;  %v1817_v36 = vld [vmem:[#allocation2 + $0x90] sm:$0xff] }
  0xfb   :  { %v153_v46 = vadd.f32 %v151_v44, %v137_v38  ;;  %v1821_v38 = vld [vmem:[#allocation2 + $0xb0] sm:$0xff] }
  0xfc   :  { %v156_v47 = vmul.f32 0.7978846, %v154_v45 }
  0xfd   :  { %v155_v48 = vmul.f32 0.7978846, %v153_v46 }
  0xfe   :  { %2501 = vtanh.f32 %v156_v47 }
  0xff   :  { %2503 = vtanh.f32 %v155_v48 }
 0x108   :  { %v2502_v49 = vpop.eup %2501 }
 0x109   :  { %v2504_v50 = vpop.eup %2503  ;;  %v160_v51 = vadd.f32 1.0, %v2502_v49 }
 0x10a   :  { %v159_v53 = vadd.f32 1.0, %v2504_v50 }
 0x10b   :  { %v162_v56 = vmul.f32 %v160_v51, %v146_v54 }
 0x10c   :  { %v161_v55 = vmul.f32 %v159_v53, %v145_v52 }
 0x10e   :  { %2428 = vmatprep.mubr.msk.f32.mxu1 %vm178_vm2, %v161_v55  ;;  %2447 = vmatprep.mubr.msk.f32.mxu0 %vm178_vm2, %v161_v55 }
 0x10f   :  { %2429 = vmatmul.mubr.msk.f32.vlgmr.msra.gmra.mrb[0].mxu1 %vm178_vm2, %v162_v56  ;;  %2448 = vmatmul.mubr.msk.f32.vlgmr.msra.gmra.mrb[2].mxu0 %vm178_vm2, %v162_v56 }
 0x110   :  { %2316 = vmatpush1.msk.msra.mxu1 %vm375_vm1, %v2697_v32  ;;  %464 = vmatprep.mubr.f32.mxu1 %v2556_v60 }
 0x111   :  { %2320 = vmatpush1.msk.msra.mxu0 %vm375_vm1, %v351_v57  ;;  %541 = vmatprep.mubr.f32.mxu0 %v2556_v60 }
 0x112   :  { %2323 = vmatprep.subr.msk.mxu1 %vm375_vm1, %v364_v61  ;;  %2327 = vmatprep.subr.msk.mxu0 %vm375_vm1, %v365_v63 }
 0x1e2   :  { %v2430_v1 = vpop.f32.mrb[0].mxu1  ;;  %v2449_v2 = vpop.f32.mrb[2].mxu0 }
 0x1e3   :  { %v251_v5 = vpop.f32.mrb[1].mxu1  ;;  %v341_v6 = vpop.f32.mrb[3].mxu0  ;;  %v257_v10 = vadd.f32 %v2430_v1, %v2309_v0  ;;  %v347_v13 = vadd.f32 %v2449_v2, %v2312_v11 }
 0x1e4   :  { %v252_v7 = vadd.f32 %v2309_v0, %v251_v5  ;;  %v342_v12 = vadd.f32 %v2312_v11, %v341_v6 }
 0x1e6   :  { %2317 = vmatmul.mubr.msk.f32.vlgmr.msra.gmra.mrb[2].mxu1 %vm368_vm3, %v252_v7  ;;  %2321 = vmatmul.mubr.msk.f32.vlgmr.msra.gmra.mrb[4].mxu0 %vm368_vm3, %v252_v7 }
 0x1e7   :  { %2324 = vmatpush1.msk.msra.mxu1 %vm375_vm1, %v352_v59  ;;  %470 = vmatprep.mubr.f32.mxu1 %v2556_v60 }
 0x1e8   :  { %547 = vmatprep.mubr.f32.mxu0 %v2556_v60  ;;  %2328 = vmatpush1.msk.msra.mxu0 %vm375_vm1, %v353_v62 }
 0x1e9   :  { %2331 = vmatprep.subr.msk.mxu1 %vm375_vm1, %v366_v8  ;;  %2335 = vmatprep.subr.msk.mxu0 %vm375_vm1, %v367_v9 }
 0x1ea   :  { %2318 = vmatmul.mubr.msk.f32.gmra.mrb[4].mxu1 %vm368_vm3, %v257_v10  ;;  %2322 = vmatmul.mubr.msk.f32.gmra.mrb[6].mxu0 %vm368_vm3, %v257_v10 }
 0x1eb   :  { %618 = vmatprep.mubr.f32.mxu1 %v2556_v60  ;;  %695 = vmatprep.mubr.f32.mxu0 %v2556_v60 }
 0x1ee   :  { %2325 = vmatmul.mubr.msk.f32.vlgmr.msra.gmra.mrb[6].mxu1 %vm368_vm3, %v252_v7  ;;  %2329 = vmatmul.mubr.msk.f32.vlgmr.msra.gmra.mrb[8].mxu0 %vm368_vm3, %v252_v7 }
 0x1ef   :  { %2332 = vmatpush1.msk.msra.mxu1 %vm375_vm1, %v2731_v3  ;;  %624 = vmatprep.mubr.f32.mxu1 %v2556_v60 }
 0x1f0   :  { %701 = vmatprep.mubr.f32.mxu0 %v2556_v60  ;;  %2336 = vmatpush1.msk.msra.mxu0 %vm375_vm1, %v2736_v4 }
 0x1f1   :  { %2339 = vmatprep.subr.msk.mxu1 %vm375_vm1, %v2701_v33  ;;  %2343 = vmatprep.subr.msk.mxu0 %vm375_vm1, %v363_v58  ;;  %v1813_v33 = vld [vmem:[#allocation2 + $0x70] sm:$0xff] }
 0x1f2   :  { %2326 = vmatmul.mubr.msk.f32.gmra.mrb[8].mxu1 %vm368_vm3, %v257_v10  ;;  %2330 = vmatmul.mubr.msk.f32.gmra.mrb[10].mxu0 %vm368_vm3, %v257_v10 }
 0x1f3   :  { %772 = vmatprep.mubr.f32.mxu1 %v2556_v60  ;;  %849 = vmatprep.mubr.f32.mxu0 %v2556_v60 }
 0x1f6   :  { %2333 = vmatmul.mubr.msk.f32.vlgmr.msra.gmra.mrb[10].mxu1 %vm368_vm3, %v252_v7  ;;  %2337 = vmatmul.mubr.msk.f32.vlgmr.msra.gmra.mrb[12].mxu0 %vm368_vm3, %v252_v7 }
 0x1f7   :  { %2340 = vmatpush1.msk.msra.mxu1 %vm375_vm1, %v2697_v32  ;;  %778 = vmatprep.mubr.f32.mxu1 %v2556_v60  ;;  %v1820_v32 = vld [vmem:[#allocation2 + $0xa8] sm:$0xff] }
 0x1f8   :  { %855 = vmatprep.mubr.f32.mxu0 %v2556_v60  ;;  %2344 = vmatpush1.msk.msra.mxu0 %vm375_vm1, %v351_v57 }
 0x1f9   :  { %2347 = vmatprep.subr.msk.mxu1 %vm375_vm1, %v364_v61  ;;  %2351 = vmatprep.subr.msk.mxu0 %vm375_vm1, %v365_v63 }
 0x1fa   :  { %2334 = vmatmul.mubr.msk.f32.gmra.mrb[12].mxu1 %vm368_vm3, %v257_v10  ;;  %2338 = vmatmul.mubr.msk.f32.gmra.mrb[14].mxu0 %vm368_vm3, %v257_v10 }
 0x1fb   :  { %932 = vmatprep.mubr.f32.mxu1 %v2556_v60  ;;  %1009 = vmatprep.mubr.f32.mxu0 %v2556_v60 }
 0x1fe   :  { %2341 = vmatmul.mubr.msk.f32.vlgmr.msra.gmra.mrb[14].mxu1 %vm368_vm3, %v342_v12  ;;  %2345 = vmatmul.mubr.msk.f32.vlgmr.msra.gmra.mrb[16].mxu0 %vm368_vm3, %v342_v12 }
 0x1ff   :  { %2348 = vmatpush1.msk.msra.mxu1 %vm375_vm1, %v352_v59  ;;  %938 = vmatprep.mubr.f32.mxu1 %v2556_v60 }
 0x200   :  { %1015 = vmatprep.mubr.f32.mxu0 %v2556_v60  ;;  %2352 = vmatpush1.msk.msra.mxu0 %vm375_vm1, %v353_v62 }
 0x201   :  { %2355 = vmatprep.subr.msk.mxu1 %vm375_vm1, %v366_v8  ;;  %2359 = vmatprep.subr.msk.mxu0 %vm375_vm1, %v367_v9 }
 0x202   :  { %2342 = vmatmul.mubr.msk.f32.gmra.mrb[16].mxu1 %vm368_vm3, %v347_v13  ;;  %2346 = vmatmul.mubr.msk.f32.gmra.mrb[18].mxu0 %vm368_vm3, %v347_v13 }
 0x203   :  { %1086 = vmatprep.mubr.f32.mxu1 %v2556_v60  ;;  %1163 = vmatprep.mubr.f32.mxu0 %v2556_v60 }
 0x206   :  { %2349 = vmatmul.mubr.msk.f32.vlgmr.msra.gmra.mrb[18].mxu1 %vm368_vm3, %v342_v12  ;;  %2353 = vmatmul.mubr.msk.f32.vlgmr.msra.gmra.mrb[20].mxu0 %vm368_vm3, %v342_v12 }
 0x207   :  { %2356 = vmatpush1.msk.msra.mxu1 %vm375_vm1, %v2731_v3  ;;  %1092 = vmatprep.mubr.f32.mxu1 %v2556_v60 }
 0x208   :  { %1169 = vmatprep.mubr.f32.mxu0 %v2556_v60  ;;  %2360 = vmatpush1.msk.msra.mxu0 %vm375_vm1, %v2736_v4 }
 0x209   :  { %1347 = vmatprep.subr.mxu1 %v1332_v14  ;;  %1489 = vmatprep.subr.mxu0 %v1336_v15 }
 0x20a   :  { %2350 = vmatmul.mubr.msk.f32.gmra.mrb[20].mxu1 %vm368_vm3, %v347_v13  ;;  %2354 = vmatmul.mubr.msk.f32.gmra.mrb[22].mxu0 %vm368_vm3, %v347_v13 }
 0x20b   :  { %1240 = vmatprep.mubr.f32.mxu1 %v2556_v60  ;;  %1317 = vmatprep.mubr.f32.mxu0 %v2556_v60 }
 0x20e   :  { %2357 = vmatmul.mubr.msk.f32.vlgmr.msra.gmra.mrb[22].mxu1 %vm368_vm3, %v342_v12  ;;  %2361 = vmatmul.mubr.msk.f32.vlgmr.msra.gmra.mrb[24].mxu0 %vm368_vm3, %v342_v12 }
 0x20f   :  { %1348 = vmatpush1.msra.mxu1 %v1331_v16  ;;  %1246 = vmatprep.mubr.f32.mxu1 %v2556_v60 }
 0x210   :  { %1323 = vmatprep.mubr.f32.mxu0 %v2556_v60  ;;  %1418 = vmatprep.subr.mxu1 %v1334_v17 }
 0x211   :  { %1490 = vmatpush1.msra.mxu0 %v1335_v18 }
 0x212   :  { %2358 = vmatmul.mubr.msk.f32.gmra.mrb[24].mxu1 %vm368_vm3, %v347_v13  ;;  %2362 = vmatmul.mubr.msk.f32.gmra.mrb[26].mxu0 %vm368_vm3, %v347_v13 }
 0x213   :  { %1411 = vmatprep.mubr.f32.mxu1 %v2556_v60  ;;  %1553 = vmatprep.mubr.f32.mxu0 %v2556_v60 }
 0x214   :  { %1631 = vmatprep.subr.mxu0 %v1340_v19 }
 0x216   :  { %2363 = vmatmul.mubr.msk.f32.vlgmr.msra.gmra.mrb[26].mxu1 %vm1343_vm4, %v1330_v20  ;;  %2365 = vmatmul.mubr.msk.f32.vlgmr.msra.gmra.mrb[28].mxu0 %vm1343_vm4, %v1330_v20 }
 0x217   :  { %1419 = vmatpush1.msra.mxu1 %v1333_v21  ;;  %1482 = vmatprep.mubr.f32.mxu1 %v2556_v60 }
 0x218   :  { %1560 = vmatprep.subr.mxu1 %v1338_v22  ;;  %1632 = vmatpush1.msra.mxu0 %v1339_v23 }
 0x219   :  { %1695 = vmatprep.mubr.f32.mxu0 %v2556_v60  ;;  %1826 = vmatprep.subr.mxu0 %v1812_v24 }
 0x21a   :  { %2364 = vmatmul.mubr.msk.f32.vlgmr.msra.gmra.mrb[28].mxu1 %vm1343_vm4, %v1330_v20  ;;  %2367 = vmatmul.mubr.msk.f32.vlgmr.msra.gmra.mrb[30].mxu0 %vm1343_vm4, %v1330_v20 }
 0x21b   :  { %1561 = vmatpush1.msra.mxu1 %v1337_v25  ;;  %1624 = vmatprep.mubr.f32.mxu1 %v2556_v60 }
 0x21c   :  { %1702 = vmatprep.subr.mxu1 %v1342_v26  ;;  %1827 = vmatpush1.msra.mxu0 %v1811_v27 }
 0x21d   :  { %1890 = vmatprep.mubr.f32.mxu0 %v2556_v60  ;;  %1968 = vmatprep.subr.mxu0 %v1816_v28 }
 0x21e   :  { %2366 = vmatmul.mubr.msk.f32.vlgmr.msra.gmra.mrb[30].mxu1 %vm1343_vm4, %v1330_v20  ;;  %2369 = vmatmul.mubr.msk.f32.vlgmr.msra.gmra.mrb[32].mxu0 %vm1343_vm4, %v1330_v20 }
 0x21f   :  { %1703 = vmatpush1.msra.mxu1 %v1341_v29  ;;  %1766 = vmatprep.mubr.f32.mxu1 %v2556_v60 }
 0x220   :  { %1897 = vmatprep.subr.mxu1 %v1814_v30  ;;  %1969 = vmatpush1.msra.mxu0 %v1815_v31 }
 0x221   :  { %2032 = vmatprep.mubr.f32.mxu0 %v2556_v60  ;;  %2110 = vmatprep.subr.mxu0 %v1820_v32 }
 0x222   :  { %2368 = vmatmul.mubr.msk.f32.vlgmr.msra.gmra.mrb[32].mxu1 %vm1343_vm4, %v1330_v20  ;;  %2371 = vmatmul.mubr.msk.f32.vlgmr.msra.gmra.mrb[34].mxu0 %vm1343_vm4, %v1330_v20 }
 0x223   :  { %1898 = vmatpush1.msra.mxu1 %v1813_v33  ;;  %1961 = vmatprep.mubr.f32.mxu1 %v2556_v60 }
 0x224   :  { %2039 = vmatprep.subr.mxu1 %v1818_v34  ;;  %2111 = vmatpush1.msra.mxu0 %v1819_v35 }
 0x225   :  { %2174 = vmatprep.mubr.f32.mxu0 %v2556_v60 }
 0x226   :  { %2370 = vmatmul.mubr.msk.f32.vlgmr.msra.gmra.mrb[34].mxu1 %vm1343_vm4, %v1330_v20  ;;  %2373 = vmatmul.mubr.msk.f32.vlgmr.msra.gmra.mrb[36].mxu0 %vm1343_vm4, %v1330_v20 }
 0x227   :  { %2040 = vmatpush1.msra.mxu1 %v1817_v36  ;;  %2103 = vmatprep.mubr.f32.mxu1 %v2556_v60 }
 0x228   :  { %2181 = vmatprep.subr.mxu1 %v1822_v37 }
 0x22a   :  { %2372 = vmatmul.mubr.msk.f32.vlgmr.msra.gmra.mrb[36].mxu1 %vm1343_vm4, %v1330_v20 }
 0x22b   :  { %2182 = vmatpush1.msra.mxu1 %v1821_v38  ;;  %2245 = vmatprep.mubr.f32.mxu1 %v2556_v60 }
 0x22e   :  { %2374 = vmatmul.mubr.msk.f32.vlgmr.msra.gmra.mrb[38].mxu1 %vm1343_vm4, %v1330_v20 }
 0x2b9   :  { %v466_v39 = vpop.f32.mrb[2].mxu1  ;;  %v2842_v40 = vpop.f32.mrb[4].mxu0 }
 0x2ba   :  { %v468_v41 = vpop.f32.mrb[3].mxu1  ;;  %v2844_v42 = vpop.f32.mrb[5].mxu0 }
 0x2bd   :  { %v2846_v43 = vpop.f32.mrb[4].mxu1  ;;  %v2848_v44 = vpop.f32.mrb[6].mxu0 }
 0x2be   :  { %v2850_v45 = vpop.f32.mrb[5].mxu1  ;;  %v2852_v46 = vpop.f32.mrb[7].mxu0 }
 0x2c1   :  { %v620_v47 = vpop.f32.mrb[6].mxu1  ;;  %v2854_v48 = vpop.f32.mrb[8].mxu0 }
 0x2c2   :  { %v622_v49 = vpop.f32.mrb[7].mxu1  ;;  %v2856_v50 = vpop.f32.mrb[9].mxu0 }
 0x2c5   :  { %v2858_v51 = vpop.f32.mrb[8].mxu1  ;;  %v2860_v52 = vpop.f32.mrb[10].mxu0 }
 0x2c6   :  { %v2862_v53 = vpop.f32.mrb[9].mxu1  ;;  %v2864_v54 = vpop.f32.mrb[11].mxu0 }
 0x2c9   :  { %v774_v55 = vpop.f32.mrb[10].mxu1  ;;  %v2866_v56 = vpop.f32.mrb[12].mxu0 }
 0x2ca   :  { %v776_v57 = vpop.f32.mrb[11].mxu1  ;;  %v2868_v58 = vpop.f32.mrb[13].mxu0 }
 0x2cd   :  { %v2870_v59 = vpop.f32.mrb[12].mxu1  ;;  %v2872_v60 = vpop.f32.mrb[14].mxu0 }
 0x2ce   :  { %2949 = vst [vmem:[#allocation8_spill] sm:$0xff] %v2872_v60  ;;  %v2874_v61 = vpop.f32.mrb[13].mxu1  ;;  %v2876_v62 = vpop.f32.mrb[15].mxu0 }
 0x2cf   :  { %2950 = vst [vmem:[#allocation9_spill] sm:$0xff] %v2876_v62 }
 0x2d1   :  { %v934_v63 = vpop.f32.mrb[14].mxu1  ;;  %v1011_v0 = vpop.f32.mrb[16].mxu0 }
 0x2d2   :  { %v936_v1 = vpop.f32.mrb[15].mxu1  ;;  %v1013_v2 = vpop.f32.mrb[17].mxu0 }
 0x2d5   :  { %v940_v3 = vpop.f32.mrb[16].mxu1  ;;  %v2878_v4 = vpop.f32.mrb[18].mxu0 }
 0x2d6   :  { %v942_v5 = vpop.f32.mrb[17].mxu1  ;;  %v2880_v6 = vpop.f32.mrb[19].mxu0 }
 0x2d9   :  { %v1088_v7 = vpop.f32.mrb[18].mxu1  ;;  %v1165_v8 = vpop.f32.mrb[20].mxu0 }
 0x2da   :  { %v1090_v9 = vpop.f32.mrb[19].mxu1  ;;  %v1167_v10 = vpop.f32.mrb[21].mxu0 }
 0x2dd   :  { %v1094_v11 = vpop.f32.mrb[20].mxu1  ;;  %v2882_v12 = vpop.f32.mrb[22].mxu0 }
 0x2de   :  { %v2884_v13 = vpop.f32.mrb[21].mxu1  ;;  %v2886_v14 = vpop.f32.mrb[23].mxu0 }
 0x2e1   :  { %v1242_v15 = vpop.f32.mrb[22].mxu1  ;;  %v1319_v16 = vpop.f32.mrb[24].mxu0 }
 0x2e2   :  { %v1244_v17 = vpop.f32.mrb[23].mxu1  ;;  %v1321_v18 = vpop.f32.mrb[25].mxu0 }
 0x2e5   :  { %v2888_v19 = vpop.f32.mrb[24].mxu1  ;;  %v2890_v20 = vpop.f32.mrb[26].mxu0 }
 0x2e6   :  { %v2892_v21 = vpop.f32.mrb[25].mxu1  ;;  %v2894_v22 = vpop.f32.mrb[27].mxu0 }
 0x2e9   :  { %v1413_v23 = vpop.f32.mrb[26].mxu1  ;;  %v1555_v24 = vpop.f32.mrb[28].mxu0 }
 0x2ea   :  { %v1773_v25 = vmul.f32 %v1413_v23, %v934_v63  ;;  %v1777_v26 = vmul.f32 %v1555_v24, %v1088_v7  ;;  %v1415_v27 = vpop.f32.mrb[27].mxu1  ;;  %v1557_v28 = vpop.f32.mrb[29].mxu0 }
 0x2eb   :  { %v1774_v29 = vmul.f32 %v1415_v27, %v936_v1  ;;  %v1778_v30 = vmul.f32 %v1557_v28, %v1090_v9 }
 0x2ec   :  { %v1785_v31 = vadd.f32 %v1773_v25, %v466_v39  ;;  %v1789_v32 = vadd.f32 %v1777_v26, %v620_v47 }
 0x2ed   :  { %v1786_v33 = vadd.f32 %v1774_v29, %v468_v41  ;;  %v1790_v34 = vadd.f32 %v1778_v30, %v622_v49  ;;  %v1484_v35 = vpop.f32.mrb[28].mxu1  ;;  %v1697_v36 = vpop.f32.mrb[30].mxu0 }
 0x2ee   :  { %1797 = vst [vmem:[#allocation5] sm:$0xff] %v1785_v31  ;;  %1801 = vst [vmem:[#allocation5 + $0x20] sm:$0xff] %v1789_v32  ;;  %v1775_v37 = vmul.f32 %v1484_v35, %v1011_v0  ;;  %v1781_v38 = vmul.f32 %v1697_v36, %v1242_v15  ;;  %v1486_v62 = vpop.f32.mrb[29].mxu1  ;;  %v1699_v60 = vpop.f32.mrb[31].mxu0 }
 0x2ef   :  { %1798 = vst [vmem:[#allocation5 + $0x8] sm:$0xff] %v1786_v33  ;;  %1802 = vst [vmem:[#allocation5 + $0x28] sm:$0xff] %v1790_v34  ;;  %v1776_v63 = vmul.f32 %v1486_v62, %v1013_v2  ;;  %v1782_v7 = vmul.f32 %v1699_v60, %v1244_v17  ;;  %v2952_v34 = vld [vmem:[#allocation9_spill] sm:$0xff] }
 0x2f0   :  { %v1787_v23 = vadd.f32 %v1775_v37, %v2842_v40  ;;  %v1793_v1 = vadd.f32 %v1781_v38, %v774_v55 }
 0x2f1   :  { %v1788_v39 = vadd.f32 %v1776_v63, %v2844_v42  ;;  %v1794_v47 = vadd.f32 %v1782_v7, %v776_v57  ;;  %v1626_v41 = vpop.f32.mrb[30].mxu1  ;;  %v1892_v49 = vpop.f32.mrb[32].mxu0 }
 0x2f2   :  { %1799 = vst [vmem:[#allocation5 + $0x10] sm:$0xff] %v1787_v23  ;;  %1805 = vst [vmem:[#allocation5 + $0x40] sm:$0xff] %v1793_v1  ;;  %v1779_v9 = vmul.f32 %v1626_v41, %v1165_v8  ;;  %v2252_v24 = vmul.f32 %v1892_v49, %v940_v3  ;;  %v1628_v0 = vpop.f32.mrb[31].mxu1  ;;  %v1894_v15 = vpop.f32.mrb[33].mxu0 }
 0x2f3   :  { %1800 = vst [vmem:[#allocation5 + $0x18] sm:$0xff] %v1788_v39  ;;  %1806 = vst [vmem:[#allocation5 + $0x48] sm:$0xff] %v1794_v47  ;;  %v1780_v25 = vmul.f32 %v1628_v0, %v1167_v10  ;;  %v2253_v26 = vmul.f32 %v1894_v15, %v942_v5 }
 0x2f4   :  { %v1791_v60 = vadd.f32 %v1779_v9, %v2854_v48  ;;  %v2264_v40 = vadd.f32 %v2252_v24, %v2846_v43 }
 0x2f5   :  { %v1792_v55 = vadd.f32 %v1780_v25, %v2856_v50  ;;  %v2265_v42 = vadd.f32 %v2253_v26, %v2850_v45  ;;  %v1768_v57 = vpop.f32.mrb[32].mxu1  ;;  %v2034_v62 = vpop.f32.mrb[34].mxu0 }
 0x2f6   :  { %1803 = vst [vmem:[#allocation5 + $0x30] sm:$0xff] %v1791_v60  ;;  %2277 = vst [vmem:[#allocation5 + $0x60] sm:$0xff] %v2264_v40  ;;  %v1783_v2 = vmul.f32 %v1768_v57, %v1319_v16  ;;  %v2256_v3 = vmul.f32 %v2034_v62, %v1094_v11  ;;  %v1770_v8 = vpop.f32.mrb[33].mxu1  ;;  %v2036_v17 = vpop.f32.mrb[35].mxu0 }
 0x2f7   :  { %1804 = vst [vmem:[#allocation5 + $0x38] sm:$0xff] %v1792_v55  ;;  %2278 = vst [vmem:[#allocation5 + $0x68] sm:$0xff] %v2265_v42  ;;  %v1784_v10 = vmul.f32 %v1770_v8, %v1321_v18  ;;  %v2257_v5 = vmul.f32 %v2036_v17, %v2884_v13 }
 0x2f8   :  { %v1795_v48 = vadd.f32 %v1783_v2, %v2866_v56  ;;  %v2268_v43 = vadd.f32 %v2256_v3, %v2858_v51 }
 0x2f9   :  { %v1796_v50 = vadd.f32 %v1784_v10, %v2868_v58  ;;  %v2269_v45 = vadd.f32 %v2257_v5, %v2862_v53  ;;  %v1963_v27 = vpop.f32.mrb[34].mxu1  ;;  %v2176_v28 = vpop.f32.mrb[36].mxu0 }
 0x2fa   :  { %1807 = vst [vmem:[#allocation5 + $0x50] sm:$0xff] %v1795_v48  ;;  %2281 = vst [vmem:[#allocation5 + $0x80] sm:$0xff] %v2268_v43  ;;  %v2254_v11 = vmul.f32 %v1963_v27, %v2878_v4  ;;  %v2260_v16 = vmul.f32 %v2176_v28, %v2888_v19  ;;  %v1965_v29 = vpop.f32.mrb[35].mxu1  ;;  %v2178_v18 = vpop.f32.mrb[37].mxu0 }
 0x2fb   :  { %1808 = vst [vmem:[#allocation5 + $0x58] sm:$0xff] %v1796_v50  ;;  %2282 = vst [vmem:[#allocation5 + $0x88] sm:$0xff] %v2269_v45  ;;  %v2255_v56 = vmul.f32 %v1965_v29, %v2880_v6  ;;  %v2261_v51 = vmul.f32 %v2178_v18, %v2892_v21 }
 0x2fc   :  { %v2266_v58 = vadd.f32 %v2254_v11, %v2848_v44  ;;  %v2272_v53 = vadd.f32 %v2260_v16, %v2870_v59 }
 0x2fd   :  { %v2267_v13 = vadd.f32 %v2255_v56, %v2852_v46  ;;  %v2273_v30 = vadd.f32 %v2261_v51, %v2874_v61  ;;  %v2105_v31 = vpop.f32.mrb[36].mxu1 }
 0x2fe   :  { %2279 = vst [vmem:[#allocation5 + $0x70] sm:$0xff] %v2266_v58  ;;  %2285 = vst [vmem:[#allocation5 + $0xa0] sm:$0xff] %v2272_v53  ;;  %v2258_v4 = vmul.f32 %v2105_v31, %v2882_v12  ;;  %v2107_v19 = vpop.f32.mrb[37].mxu1  ;;  %v2951_v12 = vld [vmem:[#allocation8_spill] sm:$0xff] }
 0x2ff   :  { %2280 = vst [vmem:[#allocation5 + $0x78] sm:$0xff] %v2267_v13  ;;  %2286 = vst [vmem:[#allocation5 + $0xa8] sm:$0xff] %v2273_v30  ;;  %v2259_v6 = vmul.f32 %v2107_v19, %v2886_v14 }
 0x300   :  { %v2270_v21 = vadd.f32 %v2258_v4, %v2860_v52 }
 0x301   :  { %v2271_v44 = vadd.f32 %v2259_v6, %v2864_v54  ;;  %v2247_v32 = vpop.f32.mrb[38].mxu1 }
 0x302   :  { %2283 = vst [vmem:[#allocation5 + $0x90] sm:$0xff] %v2270_v21  ;;  %v2262_v46 = vmul.f32 %v2247_v32, %v2890_v20  ;;  %v2249_v59 = vpop.f32.mrb[39].mxu1 }
 0x303   :  { %2284 = vst [vmem:[#allocation5 + $0x98] sm:$0xff] %v2271_v44  ;;  %v2263_v61 = vmul.f32 %v2249_v59, %v2894_v22 }
 0x304   :  { %v2274_v33 = vadd.f32 %v2262_v46, %v2951_v12 }
 0x305   :  { %v2275_v35 = vadd.f32 %v2263_v61, %v2952_v34 }
 0x306   :  { %2287 = vst [vmem:[#allocation5 + $0xb0] sm:$0xff] %v2274_v33 }
 0x307   :  { %2288 = vst [vmem:[#allocation5 + $0xb8] sm:$0xff] %v2275_v35 }
 0x308   :  { %2538 = shalt.err (!%p2535_p12)
}
 0x309   :  { %s2539_s27 = scalar_lea.hbm %s2948_s10, 3072 }
 0x30a   :  { %p2540_p13 = scmp.ne.s32.totalorder %s2948_s10, %s2539_s27  ;;  %p2543_p0 = scmp.lt.u32.totalorder %s2539_s27, %s2948_s10 }
 0x30c   :  { %p2545_p1 = pnand %p2543_p0, %p2540_p13 }
 0x30e   :  { %2548 = shalt.err (!%p2545_p1)
}
 0x30f   :  { %2300 = dma.vmem_to_hbm [thread:$0]  %s2295_s21, 3072, %s2948_s10, [#allocation4], %s2554_s23, %s2554_s23, %s2555_s24  }
 0x310   :  { %2551 = dma.done.wait [#allocation4], 3072  }
 0x311   :  { %2552 = vsyncadd [#allocation4], 4294964224 }
 0x312   :  { %2304 = vsyncpa [#allocation3], 1 }
 0x313   :  { %2305 = vsyncpa [#allocation4], 1 }

</bundles_post_ra>
